<compile_context>
chip_gen: v5e
topology: v5e:2x2
jax: 0.10.0
libtpu: 0.0.40
codegen_flags: <defaults>
</compile_context>

<pallas_src>
import functools

import jax
import jax.numpy as jnp
from jax import lax
from jax.experimental import pallas as pl
from jax.experimental.pallas import tpu as pltpu


def _round_up(x, m):
    return ((x + m - 1) // m) * m


def _temb_kernel(idx_ref, w1_ref, b1_ref, w2_ref, b2_ref, o_ref,
                 *, sub_m, n_sub, in_dim):
    # idx_ref: (tile_m, 2) int32, columns = [dayofweek, 7 + timeofday]
    # w1_ref : (295, D)    b1_ref: (1, D)
    # w2_ref : (D, emb)    b2_ref: (1, emb)
    # o_ref  : (tile_m, emb)   (true width — no lane padding written to HBM)

    def compute(row0):
        rows = pl.ds(row0, sub_m)
        idx = idx_ref[rows, :]                    # (sub_m, 2) int32
        d = idx[:, 0:1]                           # dayofweek   in [0, 7)
        t = idx[:, 1:2]                           # 7+timeofday in [7, 295)

        # Two-hot row built in-register (pure VPU compares, no HBM traffic).
        # Kept per sub-block so it stays well under the 64-vreg file.
        col = lax.broadcasted_iota(jnp.int32, (sub_m, in_dim), 1)
        two_hot = ((col == d) | (col == t)).astype(jnp.float32)

        # Conv1d(295 -> D, k=1) + bias + ReLU   (MXU "gather" of 2 rows of w1)
        h = jnp.dot(two_hot, w1_ref[...], preferred_element_type=jnp.float32)
        h = jnp.maximum(h + b1_ref[...], 0.0)

        # Conv1d(D -> emb_dim, k=1) + bias + ReLU
        y = jnp.dot(h, w2_ref[...], preferred_element_type=jnp.float32)
        y = jnp.maximum(y + b2_ref[...], 0.0)

        o_ref[rows, :] = y.astype(o_ref.dtype)

    if n_sub == 1:
        compute(0)
    else:
        def body(i, carry):
            compute(pl.multiple_of(i * sub_m, sub_m))
            return carry
        lax.fori_loop(0, n_sub, body, 0)


def temb_forward(TE, w1, b1, w2, b2, T=288):
    """TE: [B, num_his, 2] int. Returns [B, num_his, emb_dim] float32."""
    B, num_his, _ = TE.shape
    in_dim, D = w1.shape
    emb_dim = w2.shape[1]
    assert in_dim == 7 + T

    # Flatten (B, num_his) -> M and tile it.
    M = B * num_his

    # Grid tile: as large as possible (amortizes ~0.35us/step), but capped at
    # ceil(M/2) rows so the grid always has >= 2 "parallel" steps (v7x
    # megacore).  Inside the kernel the tile is chewed in sub_m-row sub-blocks
    # to keep the two-hot slab in-register.
    half = _round_up(max(-(-M // 2), 1), 8)
    tile_m = min(1024, half)
    sub_m = min(64, tile_m)
    tile_m = _round_up(tile_m, sub_m)
    m_pad = _round_up(M, tile_m)
    n_sub = tile_m // sub_m
    grid = (m_pad // tile_m,)

    # Tiny int32 index tensor instead of a dense one-hot in HBM (8 B/row).
    te = TE.reshape(M, 2).astype(jnp.int32)
    idx = jnp.stack([te[:, 0] % 7, 7 + (te[:, 1] % T)], axis=-1)
    if m_pad != M:
        idx = jnp.pad(idx, ((0, m_pad - M), (0, 0)))   # padded rows sliced off below

    grid_spec = pltpu.PrefetchScalarGridSpec(
        num_scalar_prefetch=0,
        grid=grid,
        in_specs=[
            pl.BlockSpec((tile_m, 2), lambda i: (i, 0)),      # indices (streamed)
            pl.BlockSpec((in_dim, D), lambda i: (0, 0)),      # w1 (resident)
            pl.BlockSpec((1, D), lambda i: (0, 0)),           # b1 (resident)
            pl.BlockSpec((D, emb_dim), lambda i: (0, 0)),     # w2 (resident)
            pl.BlockSpec((1, emb_dim), lambda i: (0, 0)),     # b2 (resident)
        ],
        # True-width output: last dim == full array dim, and each (tile_m, emb)
        # block is a fully contiguous HBM window -> no padded writeback.
        out_specs=pl.BlockSpec((tile_m, emb_dim), lambda i: (i, 0)),
    )

    kernel = functools.partial(_temb_kernel, sub_m=sub_m, n_sub=n_sub, in_dim=in_dim)

    flops = 2 * m_pad * (in_dim * D + D * emb_dim)
    bytes_accessed = 4 * (idx.size + w1.size + b1.size + w2.size + b2.size
                          + m_pad * emb_dim)

    out = pl.pallas_call(
        kernel,
        out_shape=jax.ShapeDtypeStruct((m_pad, emb_dim), jnp.float32),
        grid_spec=grid_spec,
        compiler_params=pltpu.CompilerParams(
            dimension_semantics=("parallel",),
            vmem_limit_bytes=32 * 1024 * 1024,
        ),
        cost_estimate=pl.CostEstimate(
            flops=flops, transcendentals=0, bytes_accessed=bytes_accessed),
    )(idx, w1, b1, w2, b2)

    # Drop the row padding and restore [B, num_his, emb_dim].
    return out[:M].reshape(B, num_his, emb_dim)


def init_params(key, D, emb_dim, T=288):
    in_dim = 7 + T
    k1, k2, k3, k4 = jax.random.split(key, 4)
    # Conv1d weight is (out_ch, in_ch, 1); we store the [in_ch, out_ch]
    # transposes directly (equivalent for k=1 convs).
    w1 = jax.random.normal(k1, (in_dim, D), jnp.float32) * 0.05
    b1 = jax.random.normal(k2, (1, D), jnp.float32) * 0.05
    w2 = jax.random.normal(k3, (D, emb_dim), jnp.float32) * 0.05
    b2 = jax.random.normal(k4, (1, emb_dim), jnp.float32) * 0.05
    return w1, b1, w2, b2


def reference_forward(TE, w1, b1, w2, b2, T=288):
    dayofweek = jax.nn.one_hot(TE[..., 0] % 7, 7, dtype=jnp.float32)
    timeofday = jax.nn.one_hot(TE[..., 1] % T, T, dtype=jnp.float32)
    x = jnp.concatenate([dayofweek, timeofday], axis=-1)
    h = jnp.maximum(x @ w1 + b1, 0.0)
    return jnp.maximum(h @ w2 + b2, 0.0)


if __name__ == "__main__":
    key = jax.random.PRNGKey(0)
    B, num_his = 2, 8
    D, emb_dim, T = 32, 16, 288

    kp, kd, kt = jax.random.split(key, 3)
    w1, b1, w2, b2 = init_params(kp, D, emb_dim, T)

    dow = jax.random.randint(kd, (B, num_his, 1), 0, 7, dtype=jnp.int32)
    tod = jax.random.randint(kt, (B, num_his, 1), 0, T, dtype=jnp.int32)
    TE = jnp.concatenate([dow, tod], axis=-1)            # [B, num_his, 2]

    out = temb_forward(TE, w1, b1, w2, b2, T=T)
    out = jax.block_until_ready(out)

    ref = reference_forward(TE, w1, b1, w2, b2, T=T)
    assert out.shape == (B, num_his, emb_dim)
    assert jnp.allclose(out, ref, atol=1e-5, rtol=1e-5)

    print("KERNEL_OK")
</pallas_src>

<mosaic_0001>
module attributes {stable_mosaic.version = 11 : i64} {
  func.func @_temb_kernel(%arg0: i32, %arg1: memref<8x2xi32, #tpu.memory_space<vmem>>, %arg2: memref<295x32xf32, #tpu.memory_space<vmem>>, %arg3: memref<1x32xf32, #tpu.memory_space<vmem>>, %arg4: memref<32x16xf32, #tpu.memory_space<vmem>>, %arg5: memref<1x16xf32, #tpu.memory_space<vmem>>, %arg6: memref<8x16xf32, #tpu.memory_space<vmem>>) attributes {dimension_semantics = [#tpu.dimension_semantics<parallel>], iteration_bounds = array<i64: 2>, scalar_prefetch = 0 : i64, scratch_operands = 0 : i64, tpu.core_type = #tpu.core_type<tc>, window_params = [{transform_indices = @transform_0, window_bounds = array<i64: 8, 2>}, {pipeline_mode = #tpu.pipeline_mode<synchronous>, transform_indices = @transform_1, window_bounds = array<i64: 295, 32>}, {pipeline_mode = #tpu.pipeline_mode<synchronous>, transform_indices = @transform_2, window_bounds = array<i64: 1, 32>}, {pipeline_mode = #tpu.pipeline_mode<synchronous>, transform_indices = @transform_3, window_bounds = array<i64: 32, 16>}, {pipeline_mode = #tpu.pipeline_mode<synchronous>, transform_indices = @transform_4, window_bounds = array<i64: 1, 16>}, {transform_indices = @transform_5, window_bounds = array<i64: 8, 16>}]} {
    %c0 = arith.constant 0 : index
    %c0_0 = arith.constant 0 : index
    %0 = vector.load %arg1[%c0, %c0_0] : memref<8x2xi32, #tpu.memory_space<vmem>>, vector<8x2xi32>
    %1 = vector.extract_strided_slice %0 {offsets = [0, 0], sizes = [8, 1], strides = [1, 1]} : vector<8x2xi32> to vector<8x1xi32>
    %2 = vector.extract_strided_slice %0 {offsets = [0, 1], sizes = [8, 1], strides = [1, 1]} : vector<8x2xi32> to vector<8x1xi32>
    %3 = tpu.iota {dimensions = array<i32: 1>} : vector<8x295xi32>
    %4 = vector.broadcast %1 : vector<8x1xi32> to vector<8x295xi32>
    %5 = arith.cmpi eq, %3, %4 : vector<8x295xi32>
    %6 = vector.broadcast %2 : vector<8x1xi32> to vector<8x295xi32>
    %7 = arith.cmpi eq, %3, %6 : vector<8x295xi32>
    %8 = arith.ori %5, %7 : vector<8x295xi1>
    %9 = arith.extui %8 : vector<8x295xi1> to vector<8x295xi32>
    %10 = arith.sitofp %9 : vector<8x295xi32> to vector<8x295xf32>
    %c0_1 = arith.constant 0 : index
    %c0_2 = arith.constant 0 : index
    %11 = vector.load %arg2[%c0_1, %c0_2] : memref<295x32xf32, #tpu.memory_space<vmem>>, vector<295x32xf32>
    %cst = arith.constant dense<0.000000e+00> : vector<8x32xf32>
    %12 = tpu.matmul %10, %11, %cst {dimension_numbers = #tpu.dot_dimension_numbers<[1], [0], [0], [1], [0, 0, 1, 1], [], []>} : vector<8x295xf32>, vector<295x32xf32>, vector<8x32xf32> -> vector<8x32xf32>
    %c0_3 = arith.constant 0 : index
    %c0_4 = arith.constant 0 : index
    %13 = vector.load %arg3[%c0_3, %c0_4] : memref<1x32xf32, #tpu.memory_space<vmem>>, vector<1x32xf32>
    %14 = vector.broadcast %13 : vector<1x32xf32> to vector<8x32xf32>
    %15 = arith.addf %12, %14 : vector<8x32xf32>
    %cst_5 = arith.constant 0.000000e+00 : f32
    %16 = vector.broadcast %cst_5 : f32 to vector<8x32xf32>
    %17 = arith.maximumf %15, %16 : vector<8x32xf32>
    %c0_6 = arith.constant 0 : index
    %c0_7 = arith.constant 0 : index
    %18 = vector.load %arg4[%c0_6, %c0_7] : memref<32x16xf32, #tpu.memory_space<vmem>>, vector<32x16xf32>
    %cst_8 = arith.constant dense<0.000000e+00> : vector<8x16xf32>
    %19 = tpu.matmul %17, %18, %cst_8 {dimension_numbers = #tpu.dot_dimension_numbers<[1], [0], [0], [1], [0, 0, 1, 1], [], []>} : vector<8x32xf32>, vector<32x16xf32>, vector<8x16xf32> -> vector<8x16xf32>
    %c0_9 = arith.constant 0 : index
    %c0_10 = arith.constant 0 : index
    %20 = vector.load %arg5[%c0_9, %c0_10] : memref<1x16xf32, #tpu.memory_space<vmem>>, vector<1x16xf32>
    %21 = vector.broadcast %20 : vector<1x16xf32> to vector<8x16xf32>
    %22 = arith.addf %19, %21 : vector<8x16xf32>
    %cst_11 = arith.constant 0.000000e+00 : f32
    %23 = vector.broadcast %cst_11 : f32 to vector<8x16xf32>
    %24 = arith.maximumf %22, %23 : vector<8x16xf32>
    %c0_12 = arith.constant 0 : index
    %c0_13 = arith.constant 0 : index
    %25 = vector.load %arg6[%c0_12, %c0_13] : memref<8x16xf32, #tpu.memory_space<vmem>>, vector<8x16xf32>
    tpu.vector_store %arg6[%c0_12, %c0_13], %24 {strides = array<i32>} : memref<8x16xf32, #tpu.memory_space<vmem>>, vector<8x16xf32>,
    return
  }
  func.func @transform_0(%arg0: i32) -> (i32, i32) {
    %c0_i32 = arith.constant 0 : i32
    %c0_i32_0 = arith.constant 0 : i32
    return %arg0, %c0_i32 : i32, i32
  }
  func.func @transform_1(%arg0: i32) -> (i32, i32) {
    %c0_i32 = arith.constant 0 : i32
    %c0_i32_0 = arith.constant 0 : i32
    %c0_i32_1 = arith.constant 0 : i32
    return %c0_i32, %c0_i32_0 : i32, i32
  }
  func.func @transform_2(%arg0: i32) -> (i32, i32) {
    %c0_i32 = arith.constant 0 : i32
    %c0_i32_0 = arith.constant 0 : i32
    %c0_i32_1 = arith.constant 0 : i32
    return %c0_i32, %c0_i32_0 : i32, i32
  }
  func.func @transform_3(%arg0: i32) -> (i32, i32) {
    %c0_i32 = arith.constant 0 : i32
    %c0_i32_0 = arith.constant 0 : i32
    %c0_i32_1 = arith.constant 0 : i32
    return %c0_i32, %c0_i32_0 : i32, i32
  }
  func.func @transform_4(%arg0: i32) -> (i32, i32) {
    %c0_i32 = arith.constant 0 : i32
    %c0_i32_0 = arith.constant 0 : i32
    %c0_i32_1 = arith.constant 0 : i32
    return %c0_i32, %c0_i32_0 : i32, i32
  }
  func.func @transform_5(%arg0: i32) -> (i32, i32) {
    %c0_i32 = arith.constant 0 : i32
    %c0_i32_0 = arith.constant 0 : i32
    return %arg0, %c0_i32 : i32, i32
  }
}

</mosaic_0001>

<bundles_post_ra>
// kernel: tpu_custom_call.1
= control target key start
LH: loop header
LB: loop body
LE: loop exit
PB: predicated region body
PF: predicated region fallthrough
CT: control target
= control target key end

     0   :  { %10 = vsyncpa [#allocation3], 0  ;;  %s843_s0 = inlined_call_operand.vmem [shape: s32[16,2], index: 0, kind: input, shape index: {}]   ;;  %s844_s1 = inlined_call_operand.vmem [shape: f32[295,32], index: 1, kind: input, shape index: {}]   ;;  %s845_s2 = inlined_call_operand.vmem [shape: f32[1,32], index: 2, kind: input, shape index: {}]   ;;  %s846_s3 = inlined_call_operand.vmem [shape: f32[32,16], index: 3, kind: input, shape index: {}]   ;;  %s847_s4 = inlined_call_operand.vmem [shape: f32[1,16], index: 4, kind: input, shape index: {}]   ;;  %s848_s5 = inlined_call_operand.hbm [shape: f32[16,16], index: 5, kind: output, shape index: {}]  }
   0x1   :  { %12 = vsyncpa [#allocation3 + $0x1], 0  ;;  %s629_s18 = smov 0   ;;  %s631_s19 = smov 0  }
   0x2   :  { %s633_s20 = smov 0   ;;  %s635_s21 = smov 0  }
   0x3 LB: > { %s650_s22 = sadd.s32 4294967295, %s593_s21   ;;  %s466_s23 = sadd.s32 4294967294, %s593_s21   ;;  %s593_s21 = sphi %s635_s21, %s854_s21   ;;  %s589_s20 = sphi %s633_s20, %s853_s20   ;;  %s585_s19 = sphi %s631_s19, %s852_s19   ;;  %s581_s18 = sphi %s629_s18, %s851_s18  }
   0x4   : > { %s654_s24 = sadd.s32 1, %s593_s21   ;;  %s135_s25 = sadd.s32 1, %s589_s20 }
   0x5   : > { %s132_s26 = ssub.s32 %s593_s21, %s654_s24  ;;  %p145_p0 = scmp.ne.s32.totalorder %s589_s20, %s585_s19 }
   0x6   : > { %p133_p1 = scmp.eq.s32.totalorder %s132_s26, 0  ;;  %p146_p2 = scmp.eq.s32.totalorder %s650_s22, 1 }
   0x7   : > { %p151_p3 = scmp.ne.s32.totalorder %s585_s19, %s581_s18  ;;  %p152_p4 = scmp.eq.s32.totalorder %s466_s23, 1 }
   0x8   : > { %s665_s27 = scalar_select %p133_p1, %s589_s20, %s135_s25  }
   0x9   : > { %p667_p5 = por %p146_p2, %p145_p0  ;;  %p671_p6 = por %p152_p4, %p151_p3 }
   0xa   : > { %p469_p7 = scmp.ge.s32.totalorder %s593_s21, 1  ;;  %p189_p8 = scmp.lt.s32.totalorder %s593_s21, 3 }
   0xc   : > { %p190_p9 = pnand %p469_p7, %p189_p8 }
   0xd   : > { %p216_p10 = scmp.lt.s32.totalorder (!%p190_p9), %s650_s22, 1  ;;  %s213_s14 = sand.u32 (!%p190_p9), 1, %s585_s19  }
   0xe   : > { %193 = sbr.rel (%p190_p9) target bundleno = 428 (0x1ac), region = 40  ;;  %s470_s15 = sshll.u32 (!%p190_p9), %s213_s14, 3 }
   0xf   : > { %s481_s16 = sshll.u32 (!%p190_p9), %s650_s22, 3  ;;  %s215_s6 = scalar_lea.vmem (!%p190_p9), [#allocation2], %s470_s15 }
  0x10   : > { %s402_s30 = scalar_lea.hbm (!%p190_p9), %s848_s5, %s481_s16 }
  0x11   : > { %s406_s8 = sshll.u32 (!%p190_p9), %s402_s30, 4  ;;  %s407_s8 = int_to_ptr.hbm [resolvable:$true] %s406_s8 }
  0x12   : > { %s545_s9 = sshra.s32 (!%p190_p9), %s407_s8, 4  ;;  %s546_s9 = int_to_ptr.hbm [resolvable:$true] %s545_s9 }
  0x13   : > { %v261_v0 = vld [vmem:[%s844_s1 + $0x78] sm:$0xff]  ;;  %v260_v2 = vld [vmem:[%s844_s1 + $0x70] sm:$0xff]  ;;  %v595_v3 = vmov 0   ;;  %s217_s13 = scalar_select %p216_p10, %s650_s22, 1  ;;  %v259_v5 = vld [vmem:[%s844_s1 + $0x68] sm:$0xff]  ;;  %v596_v19 = vmov 1   ;;  %v221_v40 = vlaneseq }
  0x14   : > { %v277_v1 = vld [vmem:[%s844_s1 + $0xf8] sm:$0xff]  ;;  %527 = vset.pattern.permute.xlu0 %v595_v3  ;;  %295 = vmatpush.msra.mxu0 %v261_v0  ;;  %v276_v4 = vld [vmem:[%s844_s1 + $0xf0] sm:$0xff]  ;;  %v275_v6 = vld [vmem:[%s844_s1 + $0xe8] sm:$0xff]  ;;  %vm291_vm0 = vcmask 1046528   ;;  %v597_v46 = vmov 1.0   ;;  %vm287_vm9 = vcmask 318464   ;;  %p552_p0 = scmp.lt.s32.totalorder %s546_s9, %s848_s5 }
  0x15   : > { %315 = vmatpush.msra.mxu1 %v277_v1  ;;  %s471_s23 = sshll.u32 %s217_s13, 3  ;;  %v258_v7 = vld [vmem:[%s844_s1 + $0x60] sm:$0xff]  ;;  %v257_v10 = vld [vmem:[%s844_s1 + $0x58] sm:$0xff]  ;;  %v256_v12 = vld [vmem:[%s844_s1 + $0x50] sm:$0xff]  ;;  %v222_v42 = vand.u32 127, %v221_v40  ;;  %v598_v47 = vmov 0.0  }
  0x16   : > { %296 = vmatpush.msra.mxu0 %v260_v2  ;;  %s219_s7 = scalar_lea.vmem %s843_s0, %s471_s23  ;;  %v274_v8 = vld [vmem:[%s844_s1 + $0xe0] sm:$0xff]  ;;  %v273_v11 = vld [vmem:[%s844_s1 + $0xd8] sm:$0xff]  ;;  %v272_v13 = vld [vmem:[%s844_s1 + $0xd0] sm:$0xff]  ;;  %vm364_vm11 = vcmask 261120   ;;  %vm389_vm12 = vcmask 130048   ;;  %s392_s22 = scalar_lea.sflag [#allocation3], %s213_s14 }
  0x17   : > { %316 = vmatpush.msra.mxu1 %v276_v4  ;;  %v220_v9 = vld [vmem:[%s219_s7] sm:$0xff]  ;;  %v255_v14 = vld [vmem:[%s844_s1 + $0x48] sm:$0xff]  ;;  %v253_v18 = vld [vmem:[%s844_s1 + $0x38] sm:$0xff]  ;;  %v223_v43 = vadd.s32 128, %v222_v42  ;;  %v224_v44 = vadd.s32 256, %v222_v42  ;;  %s404_s7 = sshll.u32 %s215_s6, 4  ;;  %s405_s7 = int_to_ptr.vmem [resolvable:$true] %s404_s7 }
  0x18   : > { %297 = vmatpush.msra.mxu0 %v259_v5  ;;  %226 = vperm.xlu0 %527, %v220_v9   ;;  %v271_v15 = vld [vmem:[%s844_s1 + $0xc8] sm:$0xff]  ;;  %v254_v16 = vld [vmem:[%s844_s1 + $0x40] sm:$0xff]  ;;  %v269_v20 = vld [vmem:[%s844_s1 + $0xb8] sm:$0xff]  ;;  %s547_s10 = scalar_lea.hbm %s546_s9, 8  ;;  %s551_s13 = scalar_lea.hbm %s848_s5, 16 }
  0x19   : > { %317 = vmatpush.msra.mxu1 %v275_v6  ;;  %v270_v17 = vld [vmem:[%s844_s1 + $0xc0] sm:$0xff]  ;;  %v252_v21 = vld [vmem:[%s844_s1 + $0x30] sm:$0xff]  ;;  %v251_v23 = vld [vmem:[%s844_s1 + $0x28] sm:$0xff]  ;;  %p548_p11 = scmp.ne.s32.totalorder %s546_s9, %s547_s10  ;;  %p553_p1 = scmp.lt.s32.totalorder %s551_s13, %s547_s10 }
  0x1a   : > { %298 = vmatpush.msra.mxu0 %v258_v7  ;;  %v268_v22 = vld [vmem:[%s844_s1 + $0xb0] sm:$0xff]  ;;  %v267_v24 = vld [vmem:[%s844_s1 + $0xa8] sm:$0xff]  ;;  %v250_v25 = vld [vmem:[%s844_s1 + $0x20] sm:$0xff] }
  0x1b   : > { %318 = vmatpush.msra.mxu1 %v274_v8  ;;  %v266_v26 = vld [vmem:[%s844_s1 + $0xa0] sm:$0xff]  ;;  %v249_v28 = vld [vmem:[%s844_s1 + $0x18] sm:$0xff]  ;;  %v280_v31 = vld [vmem:[%s844_s1 + $0x110] sm:$0xff]  ;;  %p549_p12 = pnand %p548_p11, %p667_p5  ;;  %p554_p2 = por %p553_p1, %p552_p0 }
  0x1c   : > { %299 = vmatpush.msra.mxu0 %v257_v10  ;;  %v282_v27 = vld [vmem:[%s844_s1 + $0x120] sm:$0x7f]  ;;  %v265_v29 = vld [vmem:[%s844_s1 + $0x98] sm:$0xff]  ;;  %v248_v32 = vld [vmem:[%s844_s1 + $0x10] sm:$0xff] }
  0x1d   : > { %319 = vmatpush.msra.mxu1 %v273_v11  ;;  %477 = vmatpush.msk.msra.mxu2 %vm291_vm0, %v282_v27  ;;  %v281_v30 = vld [vmem:[%s844_s1 + $0x118] sm:$0xff]  ;;  %v264_v33 = vld [vmem:[%s844_s1 + $0x90] sm:$0xff]  ;;  %v247_v34 = vld [vmem:[%s844_s1 + $0x8] sm:$0xff]  ;;  %p550_p13 = pneg %p549_p12 }
  0x1e   : > { %300 = vmatpush.msra.mxu0 %v256_v12  ;;  %v263_v35 = vld [vmem:[%s844_s1 + $0x88] sm:$0xff]  ;;  %v246_v37 = vld [vmem:[%s844_s1] sm:$0xff]  ;;  %v359_v49 = vld [vmem:[%s846_s3 + $0x18] sm:$0xff] }
  0x1f   : > { %320 = vmatpush.msra.mxu1 %v272_v13  ;;  %347 = vmatpush.msra.mxu2 %v281_v30  ;;  %v279_v36 = vld [vmem:[%s844_s1 + $0x108] sm:$0xff]  ;;  %v262_v38 = vld [vmem:[%s844_s1 + $0x80] sm:$0xff]  ;;  %v358_v50 = vld [vmem:[%s846_s3 + $0x10] sm:$0xff]  ;;  %p555_p3 = pnand %p554_p2, %p550_p13 }
  0x20   : > { %301 = vmatpush.msra.mxu0 %v255_v14  ;;  %528 = vset.pattern.permute.xlu0 %v596_v19  ;;  %v278_v39 = vld [vmem:[%s844_s1 + $0x100] sm:$0xff]  ;;  %v357_v51 = vld [vmem:[%s846_s3 + $0x8] sm:$0xff] }
  0x21   : > { %321 = vmatpush.msra.mxu1 %v271_v15  ;;  %232 = vperm.xlu0 %528, %v220_v9   ;;  %v356_v52 = vld [vmem:[%s846_s3] sm:$0xff] }
  0x22   : > { %302 = vmatpush.msra.mxu0 %v254_v16  ;;  %348 = vmatpush.msra.mxu2 %v280_v31  ;;  %v529_v53 = vld [vmem:[%s845_s2] ss:$0 sm:$0xff] }
  0x23   : > { %322 = vmatpush.msra.mxu1 %v270_v17  ;;  %380 = vmatpush.msra.mxu3 %v359_v49  ;;  %v530_v61 = vld [vmem:[%s847_s4] ss:$0 sm:$0xff] }
  0x24   : > { %303 = vmatpush.msra.mxu0 %v253_v18  ;;  %349 = vmatpush.msra.mxu2 %v279_v36 }
  0x25   : > { %323 = vmatpush.msra.mxu1 %v269_v20  ;;  %381 = vmatpush.msra.mxu3 %v358_v50 }
  0x26   : > { %304 = vmatpush.msra.mxu0 %v252_v21  ;;  %350 = vmatpush.msra.mxu2 %v278_v39 }
  0x27   : > { %324 = vmatpush.msra.mxu1 %v268_v22  ;;  %382 = vmatpush.msra.mxu3 %v357_v51 }
  0x28   : > { %305 = vmatpush.msra.mxu0 %v251_v23 }
  0x29   : > { %325 = vmatpush.msra.mxu1 %v267_v24  ;;  %383 = vmatpush.msra.mxu3 %v356_v52 }
  0x2a   : > { %306 = vmatpush.msra.mxu0 %v250_v25 }
  0x2b   : > { %326 = vmatpush.msra.mxu1 %v266_v26 }
  0x2c   : > { %307 = vmatpush.msra.mxu0 %v249_v28 }
  0x2d   : > { %327 = vmatpush.msra.mxu1 %v265_v29 }
  0x2e   : > { %308 = vmatpush.msra.mxu0 %v248_v32 }
  0x2f   : > { %328 = vmatpush.msra.mxu1 %v264_v33 }
  0x30   : > { %309 = vmatpush.msra.mxu0 %v247_v34 }
  0x31   : > { %329 = vmatpush.msra.mxu1 %v263_v35 }
  0x32   : > { %310 = vmatpush.msra.mxu0 %v246_v37 }
  0x33   : > { %330 = vmatpush.msra.mxu1 %v262_v38 }
  0x8a   : > { %v227_v41 = vpop.permute.xlu0 %226 }
  0x8b   : > { %vm228_vm4 = vcmp.eq.s32.totalorder %v222_v42, %v227_v41  ;;  %vm229_vm6 = vcmp.eq.s32.totalorder %v223_v43, %v227_v41  ;;  %vm230_vm7 = vcmp.eq.s32.totalorder %v224_v44, %v227_v41 }
  0x93   : > { %v233_v45 = vpop.permute.xlu0 %232 }
  0x94   : > { %vm234_vm1 = vcmp.eq.s32.totalorder %v222_v42, %v233_v45  ;;  %vm235_vm2 = vcmp.eq.s32.totalorder %v223_v43, %v233_v45  ;;  %vm236_vm3 = vcmp.eq.s32.totalorder %v224_v44, %v233_v45 }
  0x95   : > { %vm237_vm5 = vmor %vm228_vm4, %vm234_vm1 }
  0x96   : > { %475 = vmatmul.msk.f32.vlgmr.msra.gmra.mxu0 %vm237_vm5, %v597_v46  ;;  %vm238_vm8 = vmor %vm229_vm6, %vm235_vm2 }
  0x97   : > { %476 = vmatmul.msk.f32.vlgmr.msra.gmra.mxu1 %vm238_vm8, %v597_v46  ;;  %vm239_vm10 = vmor %vm230_vm7, %vm236_vm3 }
  0x98   : > { %v474_v48 = vsel %vm239_vm10, 1.0, %v598_v47 }
  0x99   : > { %478 = vmatmul.msk.f32.vlgmr.msra.gmra.mxu2 %vm287_vm9, %v474_v48 }
 0x113   : > { %v312_v54 = vpop.f32.mrf.mxu0 }
 0x114   : > { %v313_v55 = vadd.f32 %v529_v53, %v312_v54  ;;  %v332_v56 = vpop.f32.mrf.mxu1 }
 0x116   : > { %v333_v57 = vadd.f32 %v332_v56, %v313_v55 }
 0x11c   : > { %v352_v58 = vpop.f32.mrf.mxu2 }
 0x11d   : > { %v353_v59 = vadd.f32 %v352_v58, %v333_v57 }
 0x11f   : > { %v355_v60 = vmax.f32 %v353_v59, 0.0 }
 0x121   : > { %479 = vmatmul.msk.f32.vlgmr.msra.gmra.mxu3 %vm364_vm11, %v355_v60 }
 0x1a4   : > { %v385_v62 = vpop.f32.mrf.mxu3 }
 0x1a5   : > { %v386_v63 = vadd.f32 %v530_v61, %v385_v62 }
 0x1a7   : > { %v388_v0 = vmax.f32 %v386_v63, 0.0 }
 0x1a9   : > { %390 = vst.msk [vmem:[%s215_s6] sm:$0xff] %vm389_vm12, %v388_v0 }
 0x1aa   : > { %558 = shalt.err (!%p555_p3)
}
 0x1ab   : > { %484 = dma.vmem_to_hbm [thread:$0]  (%p667_p5), %s405_s7, 128, %s407_s8, %s392_s22  }
 0x1ac PF: > { %p490_p4 = scmp.ge.s32.totalorder %s593_s21, 2  ;;  %s418_s14 = sand.u32 1, %s581_s18  }
 0x1ad   : > { %s419_s17 = scalar_lea.sflag [#allocation3], %s418_s14 }
 0x1ae   : > { %p487_p7 = pnand %p490_p4, %p671_p6 }
 0x1b0   : > { %p488_p8 = pneg %p487_p7 }
 0x1b2   : > { %576 = dma.done.wait (%p488_p8), %s419_s17, 128  }
 0x1b3   : > { %578 = vsyncadd (%p488_p8), %s419_s17, 4294967168  ;;  %p15_p9 = scmp.ge.s32.totalorder %s654_s24, 4   ;;  %s851_s18 = smov %s585_s19 }
 0x1b4   : > { %s852_s19 = smov %s589_s20  ;;  %s853_s20 = smov %s665_s27 }
 0x1b5   : > { %s854_s21 = smov %s654_s24  ;;  %17 = sbr.rel (!%p15_p9) target bundleno = 3 (0x3), region = 75 }
 0x1ba   :  { %425 = vsyncpa [#allocation3], 1 }
 0x1bb   :  { %427 = vsyncpa [#allocation3 + $0x1], 1 }

</bundles_post_ra>
